<compile_context>
chip_gen: v7x
topology: tpu7x:2x2x1
jax: 0.10.0
libtpu: 0.0.40
codegen_flags: <defaults>
</compile_context>

<pallas_src>
import jax
import jax.numpy as jnp
from jax.experimental import pallas as pl
from jax.experimental.pallas import tpu as pltpu


_LN_EPS = 1e-5
_LANE = 128
_SUBLANE = 8


def _round_up(x, m):
    return ((x + m - 1) // m) * m


def _num_tensorcores_hint():
    """Best-effort hint: 2 for v7x-like chips (2 TCs), else 1."""
    try:
        kind = jax.devices()[0].device_kind.lower()
    except Exception:
        return 1
    return 2 if "v7" in kind else 1


def _layernorm_onepass(x, gamma, beta, n_true):
    """LayerNorm over the last dim counting only the first `n_true` features.

    Padded lanes of `x` are exactly zero by construction (zero-padded weight
    columns + zero bias padding), so sum/sum-of-squares with a 1/n_true
    denominator are exact without masking.  gamma/beta padding is zero, so
    padded output lanes stay exactly zero.
    """
    inv_n = 1.0 / float(n_true)
    mu = jnp.sum(x, axis=-1, keepdims=True) * inv_n
    var = jnp.maximum(jnp.sum(x * x, axis=-1, keepdims=True) * inv_n - mu * mu, 0.0)
    inv = jax.lax.rsqrt(var + _LN_EPS)
    return (x - mu) * inv * gamma + beta


def _make_kernel(d1p, d2p, d3p, fc1, fc2, precision):
    def kernel(state_ref, w1_ref, w2_ref, w3_ref, vec_ref, out_ref):
        x = state_ref[...]                       # (TB, d0p), already in matmul dtype
        vec = vec_ref[...]                       # (8, Dmax) f32, packed bias/LN params
        b1, g1, be1 = vec[0:1, :d1p], vec[1:2, :d1p], vec[2:3, :d1p]
        b2, g2, be2 = vec[3:4, :d2p], vec[4:5, :d2p], vec[5:6, :d2p]
        b3 = vec[6:7, :d3p]

        # --- layer 1: Linear -> ReLU -> LayerNorm ---
        h = jnp.dot(x, w1_ref[...], preferred_element_type=jnp.float32,
                    precision=precision) + b1
        h = jnp.maximum(h, 0.0)
        h = _layernorm_onepass(h, g1, be1, fc1)

        # --- layer 2: Linear -> ReLU -> LayerNorm ---
        h = jnp.dot(h.astype(w2_ref.dtype), w2_ref[...],
                    preferred_element_type=jnp.float32, precision=precision) + b2
        h = jnp.maximum(h, 0.0)
        h = _layernorm_onepass(h, g2, be2, fc2)

        # --- layer 3: Linear -> tanh (lane-dense padded output) ---
        h = jnp.dot(h.astype(w3_ref.dtype), w3_ref[...],
                    preferred_element_type=jnp.float32, precision=precision) + b3
        out_ref[...] = jnp.tanh(h).astype(out_ref.dtype)

    return kernel


def prepare_actor_params(params, *, weight_dtype=jnp.bfloat16):
    """Pad / pack / cast parameters ONCE (at init or after each optimizer step).

    params: dict with w1 [in,fc1], b1/g1/be1 [1,fc1], w2 [fc1,fc2],
            b2/g2/be2 [1,fc2], w3 [fc2,n_actions], b3 [1,n_actions]  (float32).
    """
    input_dims, fc1 = params["w1"].shape
    fc2 = params["w2"].shape[1]
    n_actions = params["w3"].shape[1]

    d0p = _round_up(input_dims, _LANE)
    d1p = _round_up(fc1, _LANE)
    d2p = _round_up(fc2, _LANE)
    d3p = _round_up(n_actions, _LANE)
    dmax = max(d1p, d2p, d3p)

    def pad2(a, rows, cols, dtype):
        a = jnp.asarray(a, jnp.float32)
        return jnp.pad(a, ((0, rows - a.shape[0]), (0, cols - a.shape[1]))).astype(dtype)

    def row(v, width):
        v = jnp.asarray(v, jnp.float32).reshape(-1)
        return jnp.pad(v, (0, width - v.shape[0]))

    # Seven [1,D] vectors packed into one (8, Dmax) f32 tile -> single small DMA.
    vec = jnp.stack(
        [row(params["b1"], dmax), row(params["g1"], dmax), row(params["be1"], dmax),
         row(params["b2"], dmax), row(params["g2"], dmax), row(params["be2"], dmax),
         row(params["b3"], dmax), jnp.zeros((dmax,), jnp.float32)],
        axis=0)

    return {
        "w1p": pad2(params["w1"], d0p, d1p, weight_dtype),
        "w2p": pad2(params["w2"], d1p, d2p, weight_dtype),
        "w3p": pad2(params["w3"], d2p, d3p, weight_dtype),
        "vec": vec,
        "dims": (int(input_dims), int(fc1), int(fc2), int(n_actions)),
        "pdims": (d0p, d1p, d2p, d3p, dmax),
        "weight_dtype": jnp.dtype(weight_dtype),
    }


def _select_batch_tiling(batch, *, max_tb=512):
    """Batch tile size + padded batch: as few grid steps as possible.

    Single tile (grid=1) on 1-TC chips; two balanced tiles on 2-TC (v7x-like)
    chips when the batch is large enough to split.  Cap tb at 512 so f32
    intermediates stay comfortably under v5e's 16 MiB scoped-VMEM default.
    """
    b8 = _round_up(max(batch, 1), _SUBLANE)
    n_steps = 1
    if _num_tensorcores_hint() >= 2 and b8 >= 2 * _SUBLANE:
        n_steps = 2
    tb = _round_up(pl.cdiv(b8, n_steps), _SUBLANE)
    tb = min(tb, max_tb)
    bp = _round_up(b8, tb)
    return tb, bp


def actor_forward(state, prepared, *, max_block_b=512):
    """ActorNetwork forward via one batch-tiled fused Pallas kernel.

    state   : [B, input_dims] float32
    prepared: output of prepare_actor_params() (padded/cast weights, packed vec).
    """
    state = jnp.asarray(state, jnp.float32)
    B, input_dims = state.shape
    in_d, fc1, fc2, n_actions = prepared["dims"]
    assert input_dims == in_d, "state feature dim does not match prepared params"
    d0p, d1p, d2p, d3p, dmax = prepared["pdims"]
    wdt = prepared["weight_dtype"]

    tb, bp = _select_batch_tiling(B, max_tb=max_block_b)

    # Pre-cast the streamed state tile to the matmul dtype (bf16 fast path).
    state_p = jnp.pad(state, ((0, bp - B), (0, d0p - input_dims))).astype(wdt)

    precision = jax.lax.Precision.HIGHEST if wdt == jnp.float32 else None
    kernel = _make_kernel(d1p, d2p, d3p, fc1, fc2, precision)

    out_p = pl.pallas_call(
        kernel,
        out_shape=jax.ShapeDtypeStruct((bp, d3p), jnp.float32),
        grid=(bp // tb,),
        in_specs=[
            pl.BlockSpec((tb, d0p), lambda i: (i, 0)),    # state: tiled over batch
            pl.BlockSpec((d0p, d1p), lambda i: (0, 0)),   # weights: VMEM-resident
            pl.BlockSpec((d1p, d2p), lambda i: (0, 0)),
            pl.BlockSpec((d2p, d3p), lambda i: (0, 0)),
            pl.BlockSpec((8, dmax), lambda i: (0, 0)),    # packed bias/LN params
        ],
        out_specs=pl.BlockSpec((tb, d3p), lambda i: (i, 0)),
        compiler_params=pltpu.CompilerParams(
            dimension_semantics=("parallel",),            # megacore-shardable batch axis
        ),
    )(state_p, prepared["w1p"], prepared["w2p"], prepared["w3p"], prepared["vec"])

    return out_p[:B, :n_actions]


def init_actor_params(key, input_dims, fc1_dims, fc2_dims, n_actions):
    """Deterministic init mirroring nn.Linear default (U(-1/sqrt(fan_in), +))."""
    def linear(key, fan_in, fan_out):
        kw, kb = jax.random.split(key)
        bound = 1.0 / jnp.sqrt(float(fan_in))
        # Stored as [fan_in, fan_out] (transposed w.r.t. PyTorch's [out, in]).
        w = jax.random.uniform(kw, (fan_in, fan_out), jnp.float32, -bound, bound)
        b = jax.random.uniform(kb, (1, fan_out), jnp.float32, -bound, bound)
        return w, b

    k1, k2, k3 = jax.random.split(key, 3)
    w1, b1 = linear(k1, input_dims, fc1_dims)
    w2, b2 = linear(k2, fc1_dims, fc2_dims)
    w3, b3 = linear(k3, fc2_dims, n_actions)
    return {
        "w1": w1, "b1": b1,
        "g1": jnp.ones((1, fc1_dims), jnp.float32),
        "be1": jnp.zeros((1, fc1_dims), jnp.float32),
        "w2": w2, "b2": b2,
        "g2": jnp.ones((1, fc2_dims), jnp.float32),
        "be2": jnp.zeros((1, fc2_dims), jnp.float32),
        "w3": w3, "b3": b3,
    }


def actor_forward_ref(state, p, matmul_dtype=jnp.float32, precision=None):
    """Pure-JAX reference; matmul_dtype/precision mimic the kernel's MXU path."""
    def mm(a, w):
        return jnp.dot(a.astype(matmul_dtype), w.astype(matmul_dtype),
                       preferred_element_type=jnp.float32, precision=precision)

    def ln(x, g, b):
        mu = jnp.mean(x, axis=-1, keepdims=True)
        var = jnp.mean((x - mu) ** 2, axis=-1, keepdims=True)
        return (x - mu) * jax.lax.rsqrt(var + _LN_EPS) * g + b

    x = jnp.maximum(mm(state, p["w1"]) + p["b1"], 0.0)
    x = ln(x, p["g1"], p["be1"])
    x = jnp.maximum(mm(x, p["w2"]) + p["b2"], 0.0)
    x = ln(x, p["g2"], p["be2"])
    return jnp.tanh(mm(x, p["w3"]) + p["b3"])


if __name__ == "__main__":
    key = jax.random.PRNGKey(0)
    k_state, k_params = jax.random.split(key)

    # Small shapes consistent with the module's forward.
    batch, input_dims, fc1_dims, fc2_dims, n_actions = 2, 16, 32, 32, 4

    state = jax.random.normal(k_state, (batch, input_dims), jnp.float32)
    params = init_actor_params(k_params, input_dims, fc1_dims, fc2_dims, n_actions)

    # Parameter padding / casting done ONCE, outside the per-call wrapper.
    prep_bf16 = prepare_actor_params(params, weight_dtype=jnp.bfloat16)
    prep_f32 = prepare_actor_params(params, weight_dtype=jnp.float32)

    # Fast path: bf16 weights + bf16 state streaming, f32 MXU accumulation.
    out_bf16 = jax.block_until_ready(actor_forward(state, prep_bf16))
    # Accuracy path: f32 weights with precision=HIGHEST dots.
    out_f32 = jax.block_until_ready(actor_forward(state, prep_f32))

    ref_f32 = actor_forward_ref(state, params, jnp.float32,
                                precision=jax.lax.Precision.HIGHEST)
    ref_bf16 = actor_forward_ref(state, params, jnp.bfloat16)

    assert out_bf16.shape == (batch, n_actions)
    assert out_f32.shape == (batch, n_actions)
    assert jnp.allclose(out_f32, ref_f32, atol=1e-4, rtol=1e-4), "f32 path mismatch"
    assert jnp.allclose(out_bf16, ref_bf16, atol=5e-3, rtol=5e-3), "bf16 path mismatch"
    assert jnp.allclose(out_bf16, ref_f32, atol=5e-2, rtol=5e-2), "bf16 drift too large"

    print("KERNEL_OK")
</pallas_src>

<mosaic_0001>
module attributes {stable_mosaic.version = 11 : i64} {
  func.func @kernel(%arg0: i32, %arg1: memref<8x128xbf16, #tpu.memory_space<vmem>>, %arg2: memref<128x128xbf16, #tpu.memory_space<vmem>>, %arg3: memref<128x128xbf16, #tpu.memory_space<vmem>>, %arg4: memref<128x128xbf16, #tpu.memory_space<vmem>>, %arg5: memref<8x128xf32, #tpu.memory_space<vmem>>, %arg6: memref<8x128xf32, #tpu.memory_space<vmem>>) attributes {dimension_semantics = [#tpu.dimension_semantics<parallel>], iteration_bounds = array<i64: 1>, scalar_prefetch = 0 : i64, scratch_operands = 0 : i64, tpu.core_type = #tpu.core_type<tc>, window_params = [{transform_indices = @transform_0, window_bounds = array<i64: 8, 128>}, {pipeline_mode = #tpu.pipeline_mode<synchronous>, transform_indices = @transform_1, window_bounds = array<i64: 128, 128>}, {pipeline_mode = #tpu.pipeline_mode<synchronous>, transform_indices = @transform_2, window_bounds = array<i64: 128, 128>}, {pipeline_mode = #tpu.pipeline_mode<synchronous>, transform_indices = @transform_3, window_bounds = array<i64: 128, 128>}, {pipeline_mode = #tpu.pipeline_mode<synchronous>, transform_indices = @transform_4, window_bounds = array<i64: 8, 128>}, {transform_indices = @transform_5, window_bounds = array<i64: 8, 128>}]} {
    %c0 = arith.constant 0 : index
    %c0_0 = arith.constant 0 : index
    %0 = vector.load %arg1[%c0, %c0_0] : memref<8x128xbf16, #tpu.memory_space<vmem>>, vector<8x128xbf16>
    %c0_1 = arith.constant 0 : index
    %c0_2 = arith.constant 0 : index
    %1 = vector.load %arg5[%c0_1, %c0_2] : memref<8x128xf32, #tpu.memory_space<vmem>>, vector<8x128xf32>
    %2 = vector.extract_strided_slice %1 {offsets = [0, 0], sizes = [1, 128], strides = [1, 1]} : vector<8x128xf32> to vector<1x128xf32>
    %3 = vector.extract_strided_slice %1 {offsets = [1, 0], sizes = [1, 128], strides = [1, 1]} : vector<8x128xf32> to vector<1x128xf32>
    %4 = vector.extract_strided_slice %1 {offsets = [2, 0], sizes = [1, 128], strides = [1, 1]} : vector<8x128xf32> to vector<1x128xf32>
    %5 = vector.extract_strided_slice %1 {offsets = [3, 0], sizes = [1, 128], strides = [1, 1]} : vector<8x128xf32> to vector<1x128xf32>
    %6 = vector.extract_strided_slice %1 {offsets = [4, 0], sizes = [1, 128], strides = [1, 1]} : vector<8x128xf32> to vector<1x128xf32>
    %7 = vector.extract_strided_slice %1 {offsets = [5, 0], sizes = [1, 128], strides = [1, 1]} : vector<8x128xf32> to vector<1x128xf32>
    %8 = vector.extract_strided_slice %1 {offsets = [6, 0], sizes = [1, 128], strides = [1, 1]} : vector<8x128xf32> to vector<1x128xf32>
    %c0_3 = arith.constant 0 : index
    %c0_4 = arith.constant 0 : index
    %9 = vector.load %arg2[%c0_3, %c0_4] : memref<128x128xbf16, #tpu.memory_space<vmem>>, vector<128x128xbf16>
    %cst = arith.constant dense<0.000000e+00> : vector<8x128xf32>
    %10 = tpu.matmul %0, %9, %cst {dimension_numbers = #tpu.dot_dimension_numbers<[1], [0], [0], [1], [0, 0, 1, 1], [], []>} : vector<8x128xbf16>, vector<128x128xbf16>, vector<8x128xf32> -> vector<8x128xf32>
    %11 = vector.broadcast %2 : vector<1x128xf32> to vector<8x128xf32>
    %12 = arith.addf %10, %11 : vector<8x128xf32>
    %cst_5 = arith.constant 0.000000e+00 : f32
    %13 = vector.broadcast %cst_5 : f32 to vector<8x128xf32>
    %14 = arith.maximumf %12, %13 : vector<8x128xf32>
    %cst_6 = arith.constant dense<0.000000e+00> : vector<8xf32>
    %15 = vector.multi_reduction <add>, %14, %cst_6 [1] : vector<8x128xf32> to vector<8xf32>
    %16 = vector.shape_cast %15 : vector<8xf32> to vector<8x1xf32>
    %cst_7 = arith.constant 3.125000e-02 : f32
    %17 = vector.broadcast %cst_7 : f32 to vector<8x1xf32>
    %18 = arith.mulf %16, %17 : vector<8x1xf32>
    %19 = arith.mulf %14, %14 : vector<8x128xf32>
    %cst_8 = arith.constant dense<0.000000e+00> : vector<8xf32>
    %20 = vector.multi_reduction <add>, %19, %cst_8 [1] : vector<8x128xf32> to vector<8xf32>
    %21 = vector.shape_cast %20 : vector<8xf32> to vector<8x1xf32>
    %cst_9 = arith.constant 3.125000e-02 : f32
    %22 = vector.broadcast %cst_9 : f32 to vector<8x1xf32>
    %23 = arith.mulf %21, %22 : vector<8x1xf32>
    %24 = arith.mulf %18, %18 : vector<8x1xf32>
    %25 = arith.subf %23, %24 : vector<8x1xf32>
    %cst_10 = arith.constant 0.000000e+00 : f32
    %26 = vector.broadcast %cst_10 : f32 to vector<8x1xf32>
    %27 = arith.maximumf %25, %26 : vector<8x1xf32>
    %cst_11 = arith.constant 9.99999974E-6 : f32
    %28 = vector.broadcast %cst_11 : f32 to vector<8x1xf32>
    %29 = arith.addf %27, %28 : vector<8x1xf32>
    %30 = math.rsqrt %29 : vector<8x1xf32>
    %31 = vector.broadcast %18 : vector<8x1xf32> to vector<8x128xf32>
    %32 = arith.subf %14, %31 : vector<8x128xf32>
    %33 = vector.broadcast %30 : vector<8x1xf32> to vector<8x128xf32>
    %34 = arith.mulf %32, %33 : vector<8x128xf32>
    %35 = vector.broadcast %3 : vector<1x128xf32> to vector<8x128xf32>
    %36 = arith.mulf %34, %35 : vector<8x128xf32>
    %37 = vector.broadcast %4 : vector<1x128xf32> to vector<8x128xf32>
    %38 = arith.addf %36, %37 : vector<8x128xf32>
    %39 = arith.truncf %38 : vector<8x128xf32> to vector<8x128xbf16>
    %c0_12 = arith.constant 0 : index
    %c0_13 = arith.constant 0 : index
    %40 = vector.load %arg3[%c0_12, %c0_13] : memref<128x128xbf16, #tpu.memory_space<vmem>>, vector<128x128xbf16>
    %cst_14 = arith.constant dense<0.000000e+00> : vector<8x128xf32>
    %41 = tpu.matmul %39, %40, %cst_14 {dimension_numbers = #tpu.dot_dimension_numbers<[1], [0], [0], [1], [0, 0, 1, 1], [], []>} : vector<8x128xbf16>, vector<128x128xbf16>, vector<8x128xf32> -> vector<8x128xf32>
    %42 = vector.broadcast %5 : vector<1x128xf32> to vector<8x128xf32>
    %43 = arith.addf %41, %42 : vector<8x128xf32>
    %cst_15 = arith.constant 0.000000e+00 : f32
    %44 = vector.broadcast %cst_15 : f32 to vector<8x128xf32>
    %45 = arith.maximumf %43, %44 : vector<8x128xf32>
    %cst_16 = arith.constant dense<0.000000e+00> : vector<8xf32>
    %46 = vector.multi_reduction <add>, %45, %cst_16 [1] : vector<8x128xf32> to vector<8xf32>
    %47 = vector.shape_cast %46 : vector<8xf32> to vector<8x1xf32>
    %cst_17 = arith.constant 3.125000e-02 : f32
    %48 = vector.broadcast %cst_17 : f32 to vector<8x1xf32>
    %49 = arith.mulf %47, %48 : vector<8x1xf32>
    %50 = arith.mulf %45, %45 : vector<8x128xf32>
    %cst_18 = arith.constant dense<0.000000e+00> : vector<8xf32>
    %51 = vector.multi_reduction <add>, %50, %cst_18 [1] : vector<8x128xf32> to vector<8xf32>
    %52 = vector.shape_cast %51 : vector<8xf32> to vector<8x1xf32>
    %cst_19 = arith.constant 3.125000e-02 : f32
    %53 = vector.broadcast %cst_19 : f32 to vector<8x1xf32>
    %54 = arith.mulf %52, %53 : vector<8x1xf32>
    %55 = arith.mulf %49, %49 : vector<8x1xf32>
    %56 = arith.subf %54, %55 : vector<8x1xf32>
    %cst_20 = arith.constant 0.000000e+00 : f32
    %57 = vector.broadcast %cst_20 : f32 to vector<8x1xf32>
    %58 = arith.maximumf %56, %57 : vector<8x1xf32>
    %cst_21 = arith.constant 9.99999974E-6 : f32
    %59 = vector.broadcast %cst_21 : f32 to vector<8x1xf32>
    %60 = arith.addf %58, %59 : vector<8x1xf32>
    %61 = math.rsqrt %60 : vector<8x1xf32>
    %62 = vector.broadcast %49 : vector<8x1xf32> to vector<8x128xf32>
    %63 = arith.subf %45, %62 : vector<8x128xf32>
    %64 = vector.broadcast %61 : vector<8x1xf32> to vector<8x128xf32>
    %65 = arith.mulf %63, %64 : vector<8x128xf32>
    %66 = vector.broadcast %6 : vector<1x128xf32> to vector<8x128xf32>
    %67 = arith.mulf %65, %66 : vector<8x128xf32>
    %68 = vector.broadcast %7 : vector<1x128xf32> to vector<8x128xf32>
    %69 = arith.addf %67, %68 : vector<8x128xf32>
    %70 = arith.truncf %69 : vector<8x128xf32> to vector<8x128xbf16>
    %c0_22 = arith.constant 0 : index
    %c0_23 = arith.constant 0 : index
    %71 = vector.load %arg4[%c0_22, %c0_23] : memref<128x128xbf16, #tpu.memory_space<vmem>>, vector<128x128xbf16>
    %cst_24 = arith.constant dense<0.000000e+00> : vector<8x128xf32>
    %72 = tpu.matmul %70, %71, %cst_24 {dimension_numbers = #tpu.dot_dimension_numbers<[1], [0], [0], [1], [0, 0, 1, 1], [], []>} : vector<8x128xbf16>, vector<128x128xbf16>, vector<8x128xf32> -> vector<8x128xf32>
    %73 = vector.broadcast %8 : vector<1x128xf32> to vector<8x128xf32>
    %74 = arith.addf %72, %73 : vector<8x128xf32>
    %75 = math.tanh %74 : vector<8x128xf32>
    %c0_25 = arith.constant 0 : index
    %c0_26 = arith.constant 0 : index
    %76 = vector.load %arg6[%c0_25, %c0_26] : memref<8x128xf32, #tpu.memory_space<vmem>>, vector<8x128xf32>
    tpu.vector_store %arg6[%c0_25, %c0_26], %75 {strides = array<i32>} : memref<8x128xf32, #tpu.memory_space<vmem>>, vector<8x128xf32>,
    return
  }
  func.func @transform_0(%arg0: i32) -> (i32, i32) {
    %c0_i32 = arith.constant 0 : i32
    %c0_i32_0 = arith.constant 0 : i32
    return %arg0, %c0_i32 : i32, i32
  }
  func.func @transform_1(%arg0: i32) -> (i32, i32) {
    %c0_i32 = arith.constant 0 : i32
    %c0_i32_0 = arith.constant 0 : i32
    %c0_i32_1 = arith.constant 0 : i32
    return %c0_i32, %c0_i32_0 : i32, i32
  }
  func.func @transform_2(%arg0: i32) -> (i32, i32) {
    %c0_i32 = arith.constant 0 : i32
    %c0_i32_0 = arith.constant 0 : i32
    %c0_i32_1 = arith.constant 0 : i32
    return %c0_i32, %c0_i32_0 : i32, i32
  }
  func.func @transform_3(%arg0: i32) -> (i32, i32) {
    %c0_i32 = arith.constant 0 : i32
    %c0_i32_0 = arith.constant 0 : i32
    %c0_i32_1 = arith.constant 0 : i32
    return %c0_i32, %c0_i32_0 : i32, i32
  }
  func.func @transform_4(%arg0: i32) -> (i32, i32) {
    %c0_i32 = arith.constant 0 : i32
    %c0_i32_0 = arith.constant 0 : i32
    %c0_i32_1 = arith.constant 0 : i32
    return %c0_i32, %c0_i32_0 : i32, i32
  }
  func.func @transform_5(%arg0: i32) -> (i32, i32) {
    %c0_i32 = arith.constant 0 : i32
    %c0_i32_0 = arith.constant 0 : i32
    return %arg0, %c0_i32 : i32, i32
  }
}

</mosaic_0001>

<bundles_post_ra>
// kernel: tpu_custom_call.1
= control target key start
LH: loop header
LB: loop body
LE: loop exit
PB: predicated region body
PF: predicated region fallthrough
CT: control target
= control target key end

     0   :  { %10 = vsyncpa [#allocation3], 0  ;;  %s899_s0 = inlined_call_operand.hbm [shape: bf16[8,128], index: 0, kind: input, shape index: {}]   ;;  %s900_s1 = inlined_call_operand.hbm [shape: bf16[128,128], index: 1, kind: input, shape index: {}]   ;;  %s901_s2 = inlined_call_operand.hbm [shape: bf16[128,128], index: 2, kind: input, shape index: {}]   ;;  %s902_s3 = inlined_call_operand.hbm [shape: bf16[128,128], index: 3, kind: input, shape index: {}]   ;;  %s903_s4 = inlined_call_operand.vmem [shape: f32[8,128], index: 4, kind: input, shape index: {}]   ;;  %s904_s5 = inlined_call_operand.hbm [shape: f32[8,128], index: 5, kind: output, shape index: {}]  }
   0x1   :  { %11 = vsyncpa [#allocation6], 0 }
   0x2   :  { %12 = vsyncpa [#allocation9], 0 }
   0x3   :  { %13 = vsyncpa [#allocation4], 0  ;;  %s740_s18 = smov [#allocation5]   ;;  %s622_s22 = scalar_lea.hbm %s900_s1, 1024 }
   0x4   :  { %s29_s19 = sshll.u32 %s740_s18, 4  ;;  %p623_p0 = scmp.ne.s32.totalorder %s900_s1, %s622_s22  ;;  %s30_s19 = int_to_ptr.vmem [resolvable:$true] %s29_s19 }
   0x5   :  { %p626_p1 = scmp.lt.u32.totalorder %s622_s22, %s900_s1 }
   0x7   :  { %p628_p2 = pnand %p626_p1, %p623_p0 }
   0x9   :  { %631 = shalt.err (!%p628_p2)
}
   0xa   :  { %s632_s27 = scalar_lea.vmem %s30_s19, 1024  ;;  %p637_p4 = scmp.lt.s32.totalorder %s30_s19, %s30_s19 }
   0xb   :  { %p633_p3 = scmp.ne.s32.totalorder %s30_s19, %s632_s27  ;;  %p638_p5 = scmp.lt.s32.totalorder %s632_s27, %s632_s27 }
   0xd   :  { %p639_p6 = por %p638_p5, %p637_p4 }
   0xf   :  { %p640_p7 = pnand %p639_p6, %p633_p3 }
  0x11   :  { %643 = shalt.err (!%p640_p7)
}
  0x12   :  { %s741_s28 = smov 64   ;;  %s742_s29 = smov 4  }
  0x13   :  { %35 = dma.hbm_to_vmem [thread:$0]  %s900_s1, 1024, %s30_s19, [#allocation6], %s741_s28, %s741_s28, %s742_s29  }
  0x14   :  { %s743_s7 = smov [#allocation2]   ;;  %s744_s9 = smov [#allocation7]  }
  0x15   :  { %s20_s8 = sshll.u32 %s743_s7, 4  ;;  %s41_s10 = sshll.u32 %s744_s9, 4  ;;  %s21_s8 = int_to_ptr.vmem [resolvable:$true] %s20_s8  ;;  %s42_s10 = int_to_ptr.vmem [resolvable:$true] %s41_s10 }
  0x16   :  { %s644_s13 = scalar_lea.hbm %s899_s0, 64 }
  0x17   :  { %p645_p8 = scmp.ne.s32.totalorder %s899_s0, %s644_s13  ;;  %p648_p9 = scmp.lt.u32.totalorder %s644_s13, %s899_s0 }
  0x19   :  { %p650_p10 = pnand %p648_p9, %p645_p8 }
  0x1b   :  { %653 = shalt.err (!%p650_p10)
}
  0x1c   :  { %s654_s1 = scalar_lea.vmem %s21_s8, 64  ;;  %p659_p12 = scmp.lt.s32.totalorder %s21_s8, %s21_s8 }
  0x1d   :  { %p655_p11 = scmp.ne.s32.totalorder %s21_s8, %s654_s1  ;;  %p660_p13 = scmp.lt.s32.totalorder %s654_s1, %s654_s1 }
  0x1f   :  { %p661_p0 = por %p660_p13, %p659_p12 }
  0x21   :  { %p662_p1 = pnand %p661_p0, %p655_p11 }
  0x23   :  { %665 = shalt.err (!%p662_p1)
}
  0x24   :  { %23 = dma.hbm_to_vmem [thread:$0]  %s899_s0, 64, %s21_s8, [#allocation3]  }
  0x25   :  { %s666_s22 = scalar_lea.hbm %s901_s2, 1024 }
  0x26   :  { %p667_p2 = scmp.ne.s32.totalorder %s901_s2, %s666_s22  ;;  %p670_p3 = scmp.lt.u32.totalorder %s666_s22, %s901_s2 }
  0x28   :  { %p672_p4 = pnand %p670_p3, %p667_p2 }
  0x2a   :  { %675 = shalt.err (!%p672_p4)
}
  0x2b   :  { %s676_s27 = scalar_lea.vmem %s42_s10, 1024  ;;  %p681_p6 = scmp.lt.s32.totalorder %s42_s10, %s42_s10 }
  0x2c   :  { %p677_p5 = scmp.ne.s32.totalorder %s42_s10, %s676_s27  ;;  %p682_p7 = scmp.lt.s32.totalorder %s676_s27, %s676_s27 }
  0x2e   :  { %p683_p8 = por %p682_p7, %p681_p6 }
  0x30   :  { %p684_p9 = pnand %p683_p8, %p677_p5 }
  0x32   :  { %687 = shalt.err (!%p684_p9)
}
  0x33   :  { %47 = dma.hbm_to_vmem [thread:$0]  %s901_s2, 1024, %s42_s10, [#allocation6], %s741_s28, %s741_s28, %s742_s29  }
  0x34   :  { %s745_s6 = smov [#allocation8]   ;;  %s688_s11 = scalar_lea.hbm %s902_s3, 1024 }
  0x35   :  { %s53_s7 = sshll.u32 %s745_s6, 4  ;;  %p689_p10 = scmp.ne.s32.totalorder %s902_s3, %s688_s11  ;;  %s54_s7 = int_to_ptr.vmem [resolvable:$true] %s53_s7 }
  0x36   :  { %p692_p11 = scmp.lt.u32.totalorder %s688_s11, %s902_s3 }
  0x38   :  { %p694_p12 = pnand %p692_p11, %p689_p10 }
  0x3a   :  { %697 = shalt.err (!%p694_p12)
}
  0x3b   :  { %s698_s16 = scalar_lea.vmem %s54_s7, 1024  ;;  %p703_p0 = scmp.lt.s32.totalorder %s54_s7, %s54_s7 }
  0x3c   :  { %p699_p13 = scmp.ne.s32.totalorder %s54_s7, %s698_s16  ;;  %p704_p1 = scmp.lt.s32.totalorder %s698_s16, %s698_s16 }
  0x3e   :  { %p705_p2 = por %p704_p1, %p703_p0 }
  0x40   :  { %p706_p3 = pnand %p705_p2, %p699_p13 }
  0x42   :  { %709 = shalt.err (!%p706_p3)
}
  0x43   :  { %59 = dma.hbm_to_vmem [thread:$0]  %s902_s3, 1024, %s54_s7, [#allocation9], %s741_s28, %s741_s28, %s742_s29  }
  0x44   :  { %732 = dma.done.wait [#allocation3], 64  }
  0x45   :  { %733 = vsyncadd [#allocation3], 4294967232 }
  0x46   :  { %734 = dma.done.wait [#allocation6], 2048  }
  0x47   :  { %735 = vsyncadd [#allocation6], 4294965248 }
  0x48   :  { %736 = dma.done.wait [#allocation9], 1024  }
  0x49   :  { %737 = vsyncadd [#allocation9], 4294966272  ;;  %v746_v0 = vmov 0.0   ;;  %vm747_vm0 = vmmov 0   ;;  %v592_v1 = vld [vmem:[#allocation5] sm:$0xff]   ;;  %v593_v2 = vld [vmem:[#allocation5 + $0x8] sm:$0xff]   ;;  %v93_v10 = vlaneseq }
  0x4a   :  { %523 = vmatprep.subr.bf16.mxu0 %v746_v0  ;;  %539 = vmatprep.mubr.msk.bf16.mxu0 %vm747_vm0, %v746_v0  ;;  %v594_v3 = vld [vmem:[#allocation5 + $0x10] sm:$0xff]   ;;  %v595_v4 = vld [vmem:[#allocation5 + $0x18] sm:$0xff]   ;;  %v596_v5 = vld [vmem:[#allocation5 + $0x20] sm:$0xff]  }
  0x4b   :  { %543 = vmatprep.subr.bf16.mxu1 %v746_v0  ;;  %559 = vmatprep.mubr.msk.bf16.mxu1 %vm747_vm0, %v746_v0  ;;  %v597_v6 = vld [vmem:[#allocation5 + $0x28] sm:$0xff]   ;;  %v598_v7 = vld [vmem:[#allocation5 + $0x30] sm:$0xff]   ;;  %v599_v8 = vld [vmem:[#allocation5 + $0x38] sm:$0xff]   ;;  %v852_v11 = vshrl.u32 %v93_v10, 7 }
  0x4c   :  { %524 = vmatpush3.bf16.msra.mxu0 %v592_v1  ;;  %v75_v9 = vld [vmem:[#allocation2] sm:$0xf]  ;;  %v858_v13 = vld [vmem:[%s903_s4] sm:$0xff]  ;;  %v600_v22 = vld [vmem:[#allocation7] sm:$0xff]   ;;  %s748_s4 = smov [#allocation10]  }
  0x4d   :  { %525 = vmatprep.subr.bf16.mxu0 %v746_v0  ;;  %v95_v12 = vsub.s32 0, %v852_v11  ;;  %544 = vmatpush3.bf16.msra.mxu1 %v600_v22  ;;  %v601_v23 = vld [vmem:[#allocation7 + $0x8] sm:$0xff]   ;;  %v602_v24 = vld [vmem:[#allocation7 + $0x10] sm:$0xff]   ;;  %v603_v25 = vld [vmem:[#allocation7 + $0x18] sm:$0xff]   ;;  %v202_v38 = vsub.s32 1, %v852_v11  ;;  %v207_v39 = vsub.s32 2, %v852_v11 }
  0x4e   :  { %545 = vmatprep.subr.bf16.mxu1 %v746_v0  ;;  %v604_v26 = vld [vmem:[#allocation7 + $0x20] sm:$0xff]   ;;  %v605_v27 = vld [vmem:[#allocation7 + $0x28] sm:$0xff]   ;;  %v606_v28 = vld [vmem:[#allocation7 + $0x30] sm:$0xff]   ;;  %v229_v48 = vsub.s32 3, %v852_v11  ;;  %v336_v10 = vsub.s32 4, %v852_v11  ;;  %s461_s29 = sshll.u32 %s748_s4, 4  ;;  %s462_s29 = int_to_ptr.vmem [resolvable:$true] %s461_s29 }
  0x4f   :  { %v96_v14 = vrot.slane %v858_v13, %v95_v12  ;;  %v607_v29 = vld [vmem:[#allocation7 + $0x38] sm:$0xff]   ;;  %v203_v41 = vrot.slane %v858_v13, %v202_v38  ;;  %v208_v44 = vrot.slane %v858_v13, %v207_v39  ;;  %v608_v57 = vld [vmem:[#allocation8] sm:$0xff]   ;;  %v609_v58 = vld [vmem:[#allocation8 + $0x8] sm:$0xff]   ;;  %v341_v12 = vsub.s32 5, %v852_v11  ;;  %s710_s17 = scalar_lea.vmem %s462_s29, 128  ;;  %p715_p5 = scmp.lt.s32.totalorder %s462_s29, %s462_s29 }
  0x50   :  { %526 = vmatpush3.bf16.msra.mxu0 %v593_v2  ;;  %v230_v49 = vrot.slane %v858_v13, %v229_v48  ;;  %v610_v59 = vld [vmem:[#allocation8 + $0x10] sm:$0xff]   ;;  %v611_v60 = vld [vmem:[#allocation8 + $0x18] sm:$0xff]   ;;  %v612_v61 = vld [vmem:[#allocation8 + $0x20] sm:$0xff]   ;;  %p711_p4 = scmp.ne.s32.totalorder %s462_s29, %s710_s17  ;;  %p716_p6 = scmp.lt.s32.totalorder %s710_s17, %s710_s17 }
  0x51   :  { %527 = vmatprep.subr.bf16.mxu0 %v746_v0  ;;  %546 = vmatpush3.bf16.msra.mxu1 %v601_v23  ;;  %v613_v62 = vld [vmem:[#allocation8 + $0x28] sm:$0xff]   ;;  %v614_v63 = vld [vmem:[#allocation8 + $0x30] sm:$0xff]   ;;  %v615_v1 = vld [vmem:[#allocation8 + $0x38] sm:$0xff]  }
  0x52   :  { %547 = vmatprep.subr.bf16.mxu1 %v746_v0  ;;  %p717_p7 = por %p716_p6, %p715_p5 }
  0x54   :  { %528 = vmatpush3.bf16.msra.mxu0 %v594_v3  ;;  %p718_p8 = pnand %p717_p7, %p711_p4 }
  0x55   :  { %529 = vmatprep.subr.bf16.mxu0 %v746_v0  ;;  %548 = vmatpush3.bf16.msra.mxu1 %v602_v24 }
  0x56   :  { %549 = vmatprep.subr.bf16.mxu1 %v746_v0 }
  0x58   :  { %530 = vmatpush3.bf16.msra.mxu0 %v595_v4 }
  0x59   :  { %531 = vmatprep.subr.bf16.mxu0 %v746_v0  ;;  %550 = vmatpush3.bf16.msra.mxu1 %v603_v25 }
  0x5a   :  { %551 = vmatprep.subr.bf16.mxu1 %v746_v0 }
  0x5c   :  { %532 = vmatpush3.bf16.msra.mxu0 %v596_v5 }
  0x5d   :  { %533 = vmatprep.subr.bf16.mxu0 %v746_v0  ;;  %552 = vmatpush3.bf16.msra.mxu1 %v604_v26 }
  0x5e   :  { %553 = vmatprep.subr.bf16.mxu1 %v746_v0 }
  0x60   :  { %534 = vmatpush3.bf16.msra.mxu0 %v597_v6 }
  0x61   :  { %535 = vmatprep.subr.bf16.mxu0 %v746_v0  ;;  %554 = vmatpush3.bf16.msra.mxu1 %v605_v27 }
  0x62   :  { %555 = vmatprep.subr.bf16.mxu1 %v746_v0 }
  0x64   :  { %536 = vmatpush3.bf16.msra.mxu0 %v598_v7 }
  0x65   :  { %537 = vmatprep.subr.bf16.mxu0 %v746_v0  ;;  %556 = vmatpush3.bf16.msra.mxu1 %v606_v28 }
  0x66   :  { %557 = vmatprep.subr.bf16.mxu1 %v746_v0 }
  0x68   :  { %538 = vmatpush3.bf16.msra.mxu0 %v599_v8 }
  0x69   :  { %563 = vmatprep.subr.bf16.mxu0 %v746_v0  ;;  %558 = vmatpush3.bf16.msra.mxu1 %v607_v29 }
  0x6b   :  { %540 = vmatmul.mubr.bf16.vlgmr.msra.gmra.mrb[0].mxu0 %v75_v9 }
  0x6c   :  { %579 = vmatprep.mubr.msk.bf16.mxu0 %vm747_vm0, %v746_v0  ;;  %564 = vmatpush3.bf16.msra.mxu0 %v608_v57 }
  0x6d   :  { %565 = vmatprep.subr.bf16.mxu0 %v746_v0 }
  0x70   :  { %566 = vmatpush3.bf16.msra.mxu0 %v609_v58 }
  0x71   :  { %567 = vmatprep.subr.bf16.mxu0 %v746_v0 }
  0x74   :  { %568 = vmatpush3.bf16.msra.mxu0 %v610_v59 }
  0x75   :  { %569 = vmatprep.subr.bf16.mxu0 %v746_v0 }
  0x78   :  { %570 = vmatpush3.bf16.msra.mxu0 %v611_v60 }
  0x79   :  { %571 = vmatprep.subr.bf16.mxu0 %v746_v0 }
  0x7c   :  { %572 = vmatpush3.bf16.msra.mxu0 %v612_v61 }
  0x7d   :  { %573 = vmatprep.subr.bf16.mxu0 %v746_v0 }
  0x80   :  { %574 = vmatpush3.bf16.msra.mxu0 %v613_v62 }
  0x81   :  { %575 = vmatprep.subr.bf16.mxu0 %v746_v0 }
  0x84   :  { %576 = vmatpush3.bf16.msra.mxu0 %v614_v63 }
  0x85   :  { %577 = vmatprep.subr.bf16.mxu0 %v746_v0  ;;  %v342_v0 = vrot.slane %v858_v13, %v341_v12 }
  0x88   :  { %578 = vmatpush3.bf16.msra.mxu0 %v615_v1 }
 0x13e   :  { %v179_v15 = vpop.f32.mrb[0].mxu0 }
 0x13f   :  { %v180_v16 = vadd.f32 %v179_v15, %v96_v14  ;;  %v541_v17 = vpop.f32.mrb[1].mxu0  ;;  %v337_v15 = vrot.slane %v858_v13, %v336_v10 }
 0x140   :  { %v182_v18 = vpop.f32.mrb[2].mxu0 }
 0x141   :  { %v185_v19 = vmax.f32 %v180_v16, 0.0  ;;  %v542_v20 = vpop.f32.mrb[3].mxu0 }
 0x143   :  { %186 = vadd.xlane.f32.xlu0 %v185_v19  ;;  %v189_v21 = vmul.f32 %v185_v19, %v185_v19 }
 0x147   :  { %190 = vadd.xlane.f32.xlu0 %v189_v21  ;;  %v363_v21 = vsub.s32 6, %v852_v11 }
 0x149   :  { %v364_v22 = vrot.slane %v858_v13, %v363_v21 }
 0x1d0   :  { %v187_v30 = vpop.xlane.xlu0 %186 }
 0x1d1   :  { %v188_v31 = vmul.f32 0.03125, %v187_v30 }
 0x1d3   :  { %v193_v33 = vmul.f32 %v188_v31, %v188_v31  ;;  %v198_v40 = vsub.f32 %v185_v19, %v188_v31 }
 0x1d4   :  { %v191_v32 = vpop.xlane.xlu0 %190 }
 0x1d5   :  { %v192_v34 = vmul.f32 0.03125, %v191_v32 }
 0x1d7   :  { %v194_v35 = vsub.f32 %v192_v34, %v193_v33 }
 0x1d9   :  { %v195_v36 = vmax.f32 %v194_v35, 0.0 }
 0x1db   :  { %v196_v37 = vadd.f32 1e-05, %v195_v36 }
 0x1dd   :  { %616 = vrsqrt.f32 %v196_v37 }
 0x1e7   :  { %v617_v42 = vpop.eup %616 }
 0x1e8   :  { %v199_v43 = vmul.f32 %v617_v42, %v198_v40 }
 0x1ea   :  { %v204_v45 = vmul.f32 %v203_v41, %v199_v43 }
 0x1ec   :  { %v209_v46 = vadd.f32 %v208_v44, %v204_v45 }
 0x1ee   :  { %v210_v47 = vpack.c.bf16 %v209_v46, %v209_v46 }
 0x1f0   :  { %560 = vmatmul.mubr.bf16.vlgmr.msra.gmra.mrb[0].mxu1 %v210_v47 }
 0x2c3   :  { %v313_v50 = vpop.f32.mrb[0].mxu1 }
 0x2c4   :  { %v314_v51 = vadd.f32 %v313_v50, %v230_v49  ;;  %v561_v52 = vpop.f32.mrb[1].mxu1 }
 0x2c5   :  { %v316_v53 = vpop.f32.mrb[2].mxu1 }
 0x2c6   :  { %v319_v54 = vmax.f32 %v314_v51, 0.0  ;;  %v562_v55 = vpop.f32.mrb[3].mxu1 }
 0x2c8   :  { %320 = vadd.xlane.f32.xlu1 %v319_v54  ;;  %v323_v56 = vmul.f32 %v319_v54, %v319_v54 }
 0x2cc   :  { %324 = vadd.xlane.f32.xlu1 %v323_v56 }
 0x355   :  { %v321_v2 = vpop.xlane.xlu1 %320 }
 0x356   :  { %v322_v3 = vmul.f32 0.03125, %v321_v2 }
 0x358   :  { %v327_v5 = vmul.f32 %v322_v3, %v322_v3  ;;  %v332_v14 = vsub.f32 %v319_v54, %v322_v3 }
 0x359   :  { %v325_v4 = vpop.xlane.xlu1 %324 }
 0x35a   :  { %v326_v6 = vmul.f32 0.03125, %v325_v4 }
 0x35c   :  { %v328_v7 = vsub.f32 %v326_v6, %v327_v5 }
 0x35e   :  { %v329_v8 = vmax.f32 %v328_v7, 0.0 }
 0x360   :  { %v330_v9 = vadd.f32 1e-05, %v329_v8 }
 0x362   :  { %618 = vrsqrt.f32 %v330_v9 }
 0x36c   :  { %v619_v16 = vpop.eup %618 }
 0x36d   :  { %v333_v17 = vmul.f32 %v619_v16, %v332_v14 }
 0x36f   :  { %v338_v18 = vmul.f32 %v337_v15, %v333_v17 }
 0x371   :  { %v343_v19 = vadd.f32 %v342_v0, %v338_v18 }
 0x373   :  { %v344_v20 = vpack.c.bf16 %v343_v19, %v343_v19 }
 0x375   :  { %580 = vmatmul.mubr.bf16.vlgmr.msra.gmra.mrb[4].mxu0 %v344_v20 }
 0x448   :  { %v447_v23 = vpop.f32.mrb[4].mxu0 }
 0x449   :  { %v448_v24 = vadd.f32 %v447_v23, %v364_v22  ;;  %v581_v25 = vpop.f32.mrb[5].mxu0 }
 0x44a   :  { %v450_v26 = vpop.f32.mrb[6].mxu0 }
 0x44b   :  { %620 = vtanh.f32 %v448_v24  ;;  %v582_v27 = vpop.f32.mrb[7].mxu0 }
 0x455   :  { %v621_v28 = vpop.eup %620 }
 0x456   :  { %454 = vst [vmem:[#allocation10] sm:$0xff] %v621_v28 }
 0x457   :  { %721 = shalt.err (!%p718_p8)
}
 0x458   :  { %s722_s19 = scalar_lea.hbm %s904_s5, 128 }
 0x459   :  { %p723_p9 = scmp.ne.s32.totalorder %s904_s5, %s722_s19  ;;  %p726_p10 = scmp.lt.u32.totalorder %s722_s19, %s904_s5 }
 0x45b   :  { %p728_p11 = pnand %p726_p10, %p723_p9 }
 0x45d   :  { %731 = shalt.err (!%p728_p11)
}
 0x45e   :  { %464 = dma.vmem_to_hbm [thread:$0]  %s462_s29, 128, %s904_s5, [#allocation4]  }
 0x45f   :  { %738 = dma.done.wait [#allocation4], 128  }
 0x460   :  { %739 = vsyncadd [#allocation4], 4294967168 }
 0x461   :  { %468 = vsyncpa [#allocation3], 1 }
 0x462   :  { %469 = vsyncpa [#allocation6], 1 }
 0x463   :  { %470 = vsyncpa [#allocation9], 1 }
 0x464   :  { %471 = vsyncpa [#allocation4], 1 }

</bundles_post_ra>
